<compile_context>
chip_gen: v5e
topology: v5e:2x2
jax: 0.10.0
libtpu: 0.0.40
codegen_flags: <defaults>
</compile_context>

<pallas_src>
import jax
import jax.numpy as jnp
from jax import lax
from jax.experimental import pallas as pl
from jax.experimental.pallas import tpu as pltpu


# Below this N the pure-JAX path (fused by XLA into neighbors) beats the
# fixed pallas_call launch + per-grid-step overhead.
_SMALL_N_THRESHOLD = 512


def _sparse_graph_learner_kernel(logits_ref, out_ref):
    """Per-tile: sigmoid (EUP); zero-diagonal mask only on diagonal tiles."""
    i = pl.program_id(0)                      # row-block index
    j = pl.program_id(1)                      # col-block index
    tr, tc = logits_ref.shape                 # static tile shape

    a = jax.nn.sigmoid(logits_ref[...])

    row0 = i * tr                             # global row origin of this tile
    col0 = j * tc                             # global col origin of this tile
    # Tile intersects the diagonal iff [row0, row0+tr) overlaps [col0, col0+tc).
    intersects = jnp.logical_and(row0 < col0 + tc, col0 < row0 + tr)

    @pl.when(intersects)
    def _():
        # Global diagonal: (col0 + c) == (row0 + r)  <=>  (c - r) == row0 - col0.
        diff = (lax.broadcasted_iota(jnp.int32, (tr, tc), 1)
                - lax.broadcasted_iota(jnp.int32, (tr, tc), 0))
        off_diag = diff != (row0 - col0)
        out_ref[...] = jnp.where(off_diag, a, jnp.zeros_like(a))

    @pl.when(jnp.logical_not(intersects))
    def _():
        out_ref[...] = a


def _sublane_pack(dtype) -> int:
    """Second-minor tile granularity: 8 (f32), 16 (bf16/f16), 32 (int8/fp8)."""
    itemsize = jnp.dtype(dtype).itemsize
    return max(8, 32 // max(1, itemsize))


def _vmem_capacity_bytes() -> int:
    """Physical VMEM per TensorCore; conservative fallback if query fails."""
    try:
        return int(pltpu.get_tpu_info().vmem_capacity_bytes)
    except Exception:  # pragma: no cover - interpret mode / unknown chip
        return 64 << 20  # v7x per-TC size: safe lower bound everywhere


def _choose_tiles(n: int, dtype, target_block_bytes: int):
    """Pick (block_rows, block_cols) with ~<= target_block_bytes per block."""
    itemsize = jnp.dtype(dtype).itemsize
    pack = _sublane_pack(dtype)

    full_bytes = n * n * itemsize
    if full_bytes <= target_block_bytes:
        # Tiny matrix: one block covering the full array (always legal).
        return n, n

    row_bytes = n * itemsize
    if pack * row_bytes <= target_block_bytes:
        # Full-width rows fit: tile rows only (lane-dense, last dim == N).
        tr = (target_block_bytes // row_bytes) // pack * pack
        return max(pack, min(n, tr)), n

    # Very wide rows: tile columns too, in multiples of 128 (unmasked vst).
    tc = (target_block_bytes // (pack * itemsize)) // 128 * 128
    tc = max(128, min(n, tc))
    tr = (target_block_bytes // (tc * itemsize)) // pack * pack
    tr = max(pack, min(n, tr))
    return tr, tc


def sparse_graph_learner(a_logits: jax.Array,
                         *,
                         block_rows: int | None = None,
                         block_cols: int | None = None,
                         force_kernel: bool = False) -> jax.Array:
    """A = sigmoid(A_logits) * (1 - eye(N)), as a tiled Pallas TPU kernel."""
    n, m = a_logits.shape
    assert n == m, "A_logits must be square"
    dtype = a_logits.dtype
    itemsize = jnp.dtype(dtype).itemsize
    pack = _sublane_pack(dtype)

    # Small-N fast path: launch overhead dominates; let XLA fuse it.
    if not force_kernel and n <= _SMALL_N_THRESHOLD \
            and block_rows is None and block_cols is None:
        return sparse_graph_learner_ref(a_logits)

    # Generation-aware budgets.  Block <= ~cap/8 keeps the double-buffered
    # footprint (2 in + 2 out) at <= cap/2, well under the explicit limit.
    vmem_cap = _vmem_capacity_bytes()
    target_block_bytes = min(8 << 20, vmem_cap // 8)
    # Explicit scoped-VMEM limit with headroom for Mosaic internal scratch:
    # ~48 MiB on v7x (64 MiB/TC), ~100 MiB on v5e/v6e (128 MiB).
    vmem_limit_bytes = min(vmem_cap - (16 << 20), 100 << 20)

    tr_auto, tc_auto = _choose_tiles(n, dtype, target_block_bytes)
    tr = block_rows if block_rows is not None else tr_auto
    tc = block_cols if block_cols is not None else tc_auto

    # Guard manual overrides so they cannot reintroduce masked stores.
    assert tc == n or tc % 128 == 0, (
        f"block_cols={tc} must equal N or be a multiple of 128 (lane-dense)")
    assert tr == n or tr % pack == 0, (
        f"block_rows={tr} must equal N or be a multiple of {pack} "
        f"for dtype {dtype}")

    grid = (pl.cdiv(n, tr), pl.cdiv(n, tc))

    return pl.pallas_call(
        _sparse_graph_learner_kernel,
        out_shape=jax.ShapeDtypeStruct((n, n), dtype),
        grid=grid,
        in_specs=[pl.BlockSpec((tr, tc), lambda i, j: (i, j))],
        out_specs=pl.BlockSpec((tr, tc), lambda i, j: (i, j)),
        compiler_params=pltpu.CompilerParams(
            # Independent tiles: let v7x's two TensorCores split the grid.
            dimension_semantics=("parallel", "parallel"),
            vmem_limit_bytes=int(vmem_limit_bytes),
        ),
        cost_estimate=pl.CostEstimate(
            flops=2 * n * n,
            transcendentals=n * n,
            bytes_accessed=2 * n * n * itemsize,
        ),
    )(a_logits)


def sparse_graph_learner_ref(a_logits: jax.Array) -> jax.Array:
    """Pure-JAX reference matching the PyTorch module."""
    a = jax.nn.sigmoid(a_logits)
    return a * (1.0 - jnp.eye(a_logits.shape[0], dtype=a_logits.dtype))


if __name__ == "__main__":
    key = jax.random.PRNGKey(0)
    k1, k2 = jax.random.split(key)

    # --- case 1: the module's typical n_series (small N).
    # The default wrapper takes the fused pure-JAX fast path; force_kernel
    # exercises the Pallas kernel at the same size and must agree.
    n_small = 16
    logits_small = jax.random.normal(k1, (n_small, n_small), dtype=jnp.float32)
    ref_small = sparse_graph_learner_ref(logits_small)

    out_fast = jax.block_until_ready(sparse_graph_learner(logits_small))
    out_kern = jax.block_until_ready(
        sparse_graph_learner(logits_small, force_kernel=True))

    assert out_kern.shape == (n_small, n_small)
    assert out_kern.dtype == jnp.float32
    assert jnp.allclose(out_fast, ref_small, atol=1e-6, rtol=1e-6)
    assert jnp.allclose(out_kern, ref_small, atol=1e-6, rtol=1e-6)
    assert jnp.all(jnp.diag(out_kern) == 0.0)

    # --- case 2: multi-block tiled path — validates the global-coordinate
    # diagonal mask and the pl.when diagonal-tile gating across a 3x3 grid
    # (diagonal and off-diagonal tiles both exercised).
    n_tiled = 384
    logits_tiled = jax.random.normal(k2, (n_tiled, n_tiled), dtype=jnp.float32)
    out_tiled = jax.block_until_ready(
        sparse_graph_learner(logits_tiled, block_rows=128, block_cols=128,
                             force_kernel=True))
    ref_tiled = sparse_graph_learner_ref(logits_tiled)
    assert jnp.allclose(out_tiled, ref_tiled, atol=1e-6, rtol=1e-6)
    assert jnp.all(jnp.diag(out_tiled) == 0.0)

    print("KERNEL_OK")
</pallas_src>

<mosaic_0001>
module attributes {stable_mosaic.version = 11 : i64} {
  func.func @_sparse_graph_learner_kernel(%arg0: i32, %arg1: i32, %arg2: memref<16x16xf32, #tpu.memory_space<vmem>>, %arg3: memref<16x16xf32, #tpu.memory_space<vmem>>) attributes {dimension_semantics = [#tpu.dimension_semantics<parallel>, #tpu.dimension_semantics<parallel>], iteration_bounds = array<i64: 1, 1>, scalar_prefetch = 0 : i64, scratch_operands = 0 : i64, tpu.core_type = #tpu.core_type<tc>, window_params = [{transform_indices = @transform_0, window_bounds = array<i64: 16, 16>}, {transform_indices = @transform_1, window_bounds = array<i64: 16, 16>}]} {
    %c0 = arith.constant 0 : index
    %c0_0 = arith.constant 0 : index
    %0 = vector.load %arg2[%c0, %c0_0] : memref<16x16xf32, #tpu.memory_space<vmem>>, vector<16x16xf32>
    %1 = arith.negf %0 : vector<16x16xf32>
    %2 = math.exp %1 : vector<16x16xf32>
    %cst = arith.constant 1.000000e+00 : f32
    %3 = vector.broadcast %cst : f32 to vector<16x16xf32>
    %4 = arith.addf %3, %2 : vector<16x16xf32>
    %5 = arith.divf %3, %4 : vector<16x16xf32>
    %c16_i32 = arith.constant 16 : i32
    %6 = arith.muli %arg0, %c16_i32 : i32
    %c16_i32_1 = arith.constant 16 : i32
    %7 = arith.muli %arg1, %c16_i32_1 : i32
    %c16_i32_2 = arith.constant 16 : i32
    %8 = arith.addi %7, %c16_i32_2 : i32
    %9 = arith.cmpi slt, %6, %8 : i32
    %c16_i32_3 = arith.constant 16 : i32
    %10 = arith.addi %6, %c16_i32_3 : i32
    %11 = arith.cmpi slt, %7, %10 : i32
    %12 = arith.andi %9, %11 : i1
    %13 = arith.extui %12 : i1 to i32
    %c0_i32 = arith.constant 0 : i32
    %14 = arith.cmpi ne, %13, %c0_i32 : i32
    scf.if %14 {
      %18 = tpu.iota {dimensions = array<i32: 1>} : vector<16x16xi32>
      %19 = tpu.iota {dimensions = array<i32: 0>} : vector<16x16xi32>
      %20 = arith.subi %18, %19 : vector<16x16xi32>
      %21 = arith.subi %6, %7 : i32
      %22 = vector.broadcast %21 : i32 to vector<16x16xi32>
      %23 = arith.cmpi ne, %20, %22 : vector<16x16xi32>
      %cst_5 = arith.constant 0.000000e+00 : f32
      %24 = vector.broadcast %cst_5 : f32 to vector<16x16xf32>
      %25 = arith.select %23, %5, %24 : vector<16x16xi1>, vector<16x16xf32>
      %c0_6 = arith.constant 0 : index
      %c0_7 = arith.constant 0 : index
      %26 = vector.load %arg3[%c0_6, %c0_7] : memref<16x16xf32, #tpu.memory_space<vmem>>, vector<16x16xf32>
      tpu.vector_store %arg3[%c0_6, %c0_7], %25 {strides = array<i32>} : memref<16x16xf32, #tpu.memory_space<vmem>>, vector<16x16xf32>,
    } else {
    }
    %true = arith.constant true
    %15 = arith.xori %12, %true : i1
    %16 = arith.extui %15 : i1 to i32
    %c0_i32_4 = arith.constant 0 : i32
    %17 = arith.cmpi ne, %16, %c0_i32_4 : i32
    scf.if %17 {
      %c0_5 = arith.constant 0 : index
      %c0_6 = arith.constant 0 : index
      %18 = vector.load %arg3[%c0_5, %c0_6] : memref<16x16xf32, #tpu.memory_space<vmem>>, vector<16x16xf32>
      tpu.vector_store %arg3[%c0_5, %c0_6], %5 {strides = array<i32>} : memref<16x16xf32, #tpu.memory_space<vmem>>, vector<16x16xf32>,
    } else {
    }
    return
  }
  func.func @transform_0(%arg0: i32, %arg1: i32) -> (i32, i32) {
    %c0_i32 = arith.constant 0 : i32
    return %arg0, %arg1 : i32, i32
  }
  func.func @transform_1(%arg0: i32, %arg1: i32) -> (i32, i32) {
    %c0_i32 = arith.constant 0 : i32
    return %arg0, %arg1 : i32, i32
  }
}

</mosaic_0001>

<bundles_post_ra>
// kernel: tpu_custom_call.1
= control target key start
LH: loop header
LB: loop body
LE: loop exit
PB: predicated region body
PF: predicated region fallthrough
CT: control target
= control target key end

     0   :  { %6 = vsyncpa [#allocation3], 0  ;;  %s220_s0 = inlined_call_operand.hbm [shape: f32[16,16], index: 0, kind: input, shape index: {}]   ;;  %s221_s1 = inlined_call_operand.hbm [shape: f32[16,16], index: 1, kind: output, shape index: {}]  }
   0x1   :  { %7 = vsyncpa [#allocation4], 0  ;;  %s12_s8 = sshll.u32 %s220_s0, 4  ;;  %s182_s9 = smov [#allocation2]   ;;  %s13_s8 = int_to_ptr.hbm [resolvable:$true] %s12_s8 }
   0x2   :  { %s14_s10 = sshll.u32 %s182_s9, 4  ;;  %s183_s11 = smov 128   ;;  %s15_s10 = int_to_ptr.vmem [resolvable:$true] %s14_s10 }
   0x3   :  { %s184_s12 = smov 8  }
   0x4   :  { %20 = dma.hbm_to_vmem [thread:$0]  %s13_s8, 256, %s15_s10, [#allocation3], %s183_s11, %s183_s11, %s184_s12  }
   0x5   :  { %178 = dma.done.wait [#allocation3], 256  }
   0x6   :  { %179 = vsyncadd [#allocation3], 4294967040  ;;  %v25_v0 = vld [vmem:[#allocation2] sm:$0xff]  ;;  %v26_v1 = vld [vmem:[#allocation2 + $0x8] sm:$0xff]  ;;  %v75_v7 = vlaneseq  ;;  %s185_s0 = smov [#allocation5]   ;;  %s103_s16 = sshll.u32 %s221_s1, 4  ;;  %s104_s16 = int_to_ptr.hbm [resolvable:$true] %s103_s16 }
   0x7   :  { %v116_v2 = vmul.f32 -1.442695, %v25_v0  ;;  %v117_v3 = vmul.f32 -1.442695, %v26_v1  ;;  %s101_s13 = sshll.u32 %s185_s0, 4  ;;  %vm88_vm9 = vcmask 130048   ;;  %s102_s13 = int_to_ptr.vmem [resolvable:$true] %s101_s13 }
   0x8   :  { %v78_v9 = vshrl.u32 %v75_v7, 7  ;;  %v76_v10 = vand.u32 127, %v75_v7 }
   0x9   :  { %122 = vpow2.f32 %v116_v2 }
   0xa   :  { %124 = vpow2.f32 %v117_v3  ;;  %v79_v14 = vadd.s32 8, %v78_v9  ;;  %v80_v16 = vsub.s32 %v76_v10, %v78_v9 }
   0xc   :  { %v81_v24 = vsub.s32 %v76_v10, %v79_v14  ;;  %vm206_vm7 = vcmp.ne.s32.totalorder %v80_v16, 0 }
   0xe   :  { %vm85_vm10 = vcmp.ne.s32.totalorder %v81_v24, 0 }
   0xf   :  { %v123_v4 = vpop.eup %122 }
  0x10   :  { %v125_v5 = vpop.eup %124  ;;  %v33_v6 = vadd.f32 1.0, %v123_v4 }
  0x11   :  { %v34_v8 = vadd.f32 1.0, %v125_v5 }
  0x12   :  { %126 = vrcp.f32 %v33_v6  ;;  %vm40_vm0 = vweird.f32 %v33_v6  ;;  %v46_v15 = vand.u32 2147483648, %v33_v6  ;;  %v44_v19 = vand.u32 2147483647, %v33_v6 }
  0x13   :  { %128 = vrcp.f32 %v34_v8  ;;  %v61_v20 = vand.u32 2147483648, %v34_v8  ;;  %vm55_vm2 = vweird.f32 %v34_v8  ;;  %v59_v22 = vand.u32 2147483647, %v34_v8 }
  0x14   :  { %v47_v26 = vor.u32 1.1754944e-38, %v46_v15  ;;  %vm45_vm5 = vcmp.eq.f32.partialorder %v44_v19, 8.507059e+37 }
  0x15   :  { %v62_v29 = vor.u32 1.1754944e-38, %v61_v20  ;;  %vm60_vm8 = vcmp.eq.f32.partialorder %v59_v22, 8.507059e+37 }
  0x18   :  { %v127_v11 = vpop.eup %126 }
  0x19   :  { %v129_v12 = vpop.eup %128  ;;  %v36_v13 = vmul.f32 %v127_v11, %v33_v6  ;;  %vm41_vm1 = vweird.f32 %v127_v11 }
  0x1a   :  { %v51_v17 = vmul.f32 %v129_v12, %v34_v8  ;;  %vm56_vm3 = vweird.f32 %v129_v12  ;;  %vm202_vm4 = vmor %vm40_vm0, %vm41_vm1 }
  0x1b   :  { %v37_v18 = vsub.f32 1.0, %v36_v13  ;;  %vm57_vm6 = vmor %vm55_vm2, %vm56_vm3 }
  0x1c   :  { %v52_v21 = vsub.f32 1.0, %v51_v17 }
  0x1d   :  { %v38_v23 = vmul.f32 %v127_v11, %v37_v18 }
  0x1e   :  { %v53_v27 = vmul.f32 %v129_v12, %v52_v21 }
  0x1f   :  { %v39_v28 = vadd.f32 %v127_v11, %v38_v23 }
  0x20   :  { %v54_v31 = vadd.f32 %v129_v12, %v53_v27 }
  0x21   :  { %v43_v32 = vsel %vm202_vm4, %v127_v11, %v39_v28 }
  0x22   :  { %v48_v33 = vsel %vm45_vm5, %v47_v26, %v43_v32  ;;  %v58_v34 = vsel %vm57_vm6, %v129_v12, %v54_v31 }
  0x23   :  { %v86_v35 = vsel %vm206_vm7, %v48_v33, 0.0  ;;  %v63_v36 = vsel %vm60_vm8, %v62_v29, %v58_v34 }
  0x24   :  { %89 = vst.msk [vmem:[#allocation5] sm:$0xff] %vm88_vm9, %v86_v35  ;;  %v87_v37 = vsel %vm85_vm10, %v63_v36, 0.0 }
  0x25   :  { %90 = vst.msk [vmem:[#allocation5 + $0x8] sm:$0xff] %vm88_vm9, %v87_v37 }
  0x26   :  { %109 = dma.vmem_to_hbm [thread:$0]  %s102_s13, 256, %s104_s16, [#allocation4], %s183_s11, %s183_s11, %s184_s12  }
  0x27   :  { %180 = dma.done.wait [#allocation4], 256  }
  0x28   :  { %181 = vsyncadd [#allocation4], 4294967040 }
  0x29   :  { %114 = vsyncpa [#allocation3], 1 }
  0x2a   :  { %115 = vsyncpa [#allocation4], 1 }

</bundles_post_ra>
